<compile_context>
chip_gen: v7x
topology: tpu7x:2x2x1
jax: 0.10.0
libtpu: 0.0.40
codegen_flags: <defaults>
</compile_context>

<pallas_src>
import functools

import jax
import jax.numpy as jnp
from jax.experimental import pallas as pl
from jax.experimental.pallas import tpu as pltpu


def _round_up(x, m):
    return (x + m - 1) // m * m


def _gcn3_kernel(x_ref, adj_ref, dis_ref, w1_ref, b1_ref, w2_ref, b2_ref,
                 w3_ref, b3_ref, h_ref, logp_ref, *, dim_out):
    """Fused 3-layer GCN forward with relu + masked log_softmax."""
    x = x_ref[...]            # [Np, Fp]  f32 node features (zero-padded)
    adj = adj_ref[...]        # [Np, Np]  bf16 weighted adjacency (tgt, src) incl. self-loops
    dis = dis_ref[...]        # [Np, 1]   f32 deg^{-1/2}, precomputed in the wrapper

    def gcn_layer(z, w_ref, b_ref):
        # out = dis * (adj @ (dis * (z @ W))) + b
        # Aggregation matmul uses bf16 MXU operands, accumulates in f32.
        zw = jnp.dot(z, w_ref[...], preferred_element_type=jnp.float32)
        agg = jnp.dot(adj, (dis * zw).astype(jnp.bfloat16),
                      preferred_element_type=jnp.float32)
        return dis * agg + b_ref[...]

    h1 = jnp.maximum(gcn_layer(x, w1_ref, b1_ref), 0.0)
    # TODO(synk): training-mode dropout (p=0.5) not implemented; inference path only.
    h2 = jnp.maximum(gcn_layer(h1, w2_ref, b2_ref), 0.0)
    h3 = gcn_layer(h2, w3_ref, b3_ref)

    h_ref[...] = h3                                          # one full-width store

    # log_softmax over the valid (unpadded) class lanes only.
    col = jax.lax.broadcasted_iota(jnp.int32, h3.shape, 1)
    valid = col < dim_out
    h3m = jnp.where(valid, h3, jnp.float32(-1e30))
    m = jnp.max(h3m, axis=1, keepdims=True)
    p = jnp.where(valid, jnp.exp(h3m - m), 0.0)
    lse = m + jnp.log(jnp.sum(p, axis=1, keepdims=True))
    logp_ref[...] = h3 - lse                                 # one full-width store


def gcn_forward(x, adj, params, *, dim_out):
    """x: [N, F] node features, adj: [N, N] weighted adjacency with self-loops."""
    (w1, b1), (w2, b2), (w3, b3) = params
    N, f_in = x.shape
    dim_h = w1.shape[1]

    # Pad nodes to a sublane multiple and feature dims to lane-dense (128) widths.
    np_ = _round_up(max(N, 8), 8)
    fp = _round_up(max(f_in, 128), 128)
    hp = _round_up(max(dim_h, 128), 128)
    dp = _round_up(max(dim_out, 128), 128)

    # Padded adjacency in f32 (for an exact degree rowsum), then bf16 for the MXU.
    adj32 = jnp.zeros((np_, np_), jnp.float32).at[:N, :N].set(adj)
    deg = jnp.sum(adj32, axis=1, keepdims=True)                       # hoisted out of kernel
    dis = jnp.where(deg > 0.0, jax.lax.rsqrt(deg), 0.0)               # zero-degree (padding) safe
    adjp = adj32.astype(jnp.bfloat16)

    xp = jnp.zeros((np_, fp), jnp.float32).at[:N, :f_in].set(x)
    w1p = jnp.zeros((fp, hp), jnp.float32).at[:f_in, :dim_h].set(w1)
    b1p = jnp.zeros((1, hp), jnp.float32).at[:, :dim_h].set(b1)
    w2p = jnp.zeros((hp, hp), jnp.float32).at[:dim_h, :dim_h].set(w2)
    b2p = jnp.zeros((1, hp), jnp.float32).at[:, :dim_h].set(b2)
    w3p = jnp.zeros((hp, dp), jnp.float32).at[:dim_h, :dim_out].set(w3)
    b3p = jnp.zeros((1, dp), jnp.float32).at[:, :dim_out].set(b3)

    # Explicit scoped-VMEM sizing: operands + outputs + in-kernel temporaries
    # (zw/agg/h1/h2/h3/softmax), with 2x headroom; capped to v7x's 64 MiB VMEM.
    operand_bytes = (xp.size * 4 + adjp.size * 2 + np_ * 128 * 4
                     + (w1p.size + w2p.size + w3p.size) * 4
                     + 3 * 8 * 128 * 4)
    out_bytes = 2 * np_ * dp * 4
    temp_bytes = 8 * np_ * max(fp, hp, dp) * 4
    vmem_limit = int(min(64 << 20,
                         max(16 << 20, 2 * (operand_bytes + out_bytes + temp_bytes))))

    vmem = pl.BlockSpec(memory_space=pltpu.MemorySpace.VMEM)
    kernel = functools.partial(_gcn3_kernel, dim_out=dim_out)
    h_pad, logp_pad = pl.pallas_call(
        kernel,
        out_shape=(jax.ShapeDtypeStruct((np_, dp), jnp.float32),
                   jax.ShapeDtypeStruct((np_, dp), jnp.float32)),
        in_specs=[vmem] * 9,
        out_specs=(vmem, vmem),
        compiler_params=pltpu.CompilerParams(vmem_limit_bytes=vmem_limit),
    )(xp, adjp, dis, w1p, b1p, w2p, b2p, w3p, b3p)
    return h_pad[:N, :dim_out], logp_pad[:N, :dim_out]


def glorot(key, shape):
    fan_in, fan_out = shape
    lim = jnp.sqrt(6.0 / (fan_in + fan_out))
    return jax.random.uniform(key, shape, jnp.float32, -lim, lim)


def init_gcn_params(key, dim_in, dim_h, dim_out):
    """GCNConv params: lin weight pre-transposed to [in, out], bias zero-init."""
    k1, k2, k3 = jax.random.split(key, 3)
    w1 = glorot(k1, (dim_in, dim_h))
    w2 = glorot(k2, (dim_h, dim_h))
    w3 = glorot(k3, (dim_h, dim_out))
    zeros = lambda d: jnp.zeros((1, d), jnp.float32)
    return ((w1, zeros(dim_h)), (w2, zeros(dim_h)), (w3, zeros(dim_out)))


def build_weighted_adjacency(edge_index, edge_attr, num_nodes):
    """Dense weighted adjacency adj[target, source] + remaining self-loops (w=1)."""
    src, dst = edge_index[0], edge_index[1]
    adj = jnp.zeros((num_nodes, num_nodes), jnp.float32).at[dst, src].add(edge_attr)
    diag = jnp.diagonal(adj)
    idx = jnp.arange(num_nodes)
    # NOTE: matches PyG add_remaining_self_loops for positive existing weights.
    return adj.at[idx, idx].set(jnp.where(diag > 0, diag, 1.0))


if __name__ == "__main__":
    N, dim_in, dim_h, dim_out = 16, 8, 16, 4

    key = jax.random.PRNGKey(0)
    kx, kw, ke = jax.random.split(key, 3)
    x = jax.random.normal(kx, (N, dim_in), jnp.float32)

    # Small deterministic graph: ring edges in both directions with edge weights.
    # edge_index row 0 = source nodes, row 1 = target nodes (PyG convention).
    src = jnp.concatenate([jnp.arange(N), (jnp.arange(N) + 1) % N])
    dst = jnp.concatenate([(jnp.arange(N) + 1) % N, jnp.arange(N)])
    edge_index = jnp.stack([src, dst]).astype(jnp.int32)          # [2, 2N]
    edge_attr = jax.random.uniform(ke, (2 * N,), jnp.float32, 0.5, 1.5)

    adj = build_weighted_adjacency(edge_index, edge_attr, N)
    params = init_gcn_params(kw, dim_in, dim_h, dim_out)

    h, log_probs = gcn_forward(x, adj, params, dim_out=dim_out)
    jax.block_until_ready((h, log_probs))

    assert h.shape == (N, dim_out) and log_probs.shape == (N, dim_out)
    assert bool(jnp.all(jnp.isfinite(h))) and bool(jnp.all(jnp.isfinite(log_probs)))
    # softmax rows must sum to 1
    assert bool(jnp.allclose(jnp.sum(jnp.exp(log_probs), axis=1), 1.0, atol=1e-4))
    print("KERNEL_OK")
</pallas_src>

<mosaic_0001>
module attributes {stable_mosaic.version = 11 : i64} {
  func.func @_gcn3_kernel(%arg0: memref<16x128xf32, #tpu.memory_space<vmem>>, %arg1: memref<16x16xbf16, #tpu.memory_space<vmem>>, %arg2: memref<16x1xf32, #tpu.memory_space<vmem>>, %arg3: memref<128x128xf32, #tpu.memory_space<vmem>>, %arg4: memref<1x128xf32, #tpu.memory_space<vmem>>, %arg5: memref<128x128xf32, #tpu.memory_space<vmem>>, %arg6: memref<1x128xf32, #tpu.memory_space<vmem>>, %arg7: memref<128x128xf32, #tpu.memory_space<vmem>>, %arg8: memref<1x128xf32, #tpu.memory_space<vmem>>, %arg9: memref<16x128xf32, #tpu.memory_space<vmem>>, %arg10: memref<16x128xf32, #tpu.memory_space<vmem>>) attributes {dimension_semantics = [], scalar_prefetch = 0 : i64, scratch_operands = 0 : i64, tpu.core_type = #tpu.core_type<tc>} {
    %c0 = arith.constant 0 : index
    %c0_0 = arith.constant 0 : index
    %0 = vector.load %arg0[%c0, %c0_0] : memref<16x128xf32, #tpu.memory_space<vmem>>, vector<16x128xf32>
    %c0_1 = arith.constant 0 : index
    %c0_2 = arith.constant 0 : index
    %1 = vector.load %arg1[%c0_1, %c0_2] : memref<16x16xbf16, #tpu.memory_space<vmem>>, vector<16x16xbf16>
    %c0_3 = arith.constant 0 : index
    %c0_4 = arith.constant 0 : index
    %2 = vector.load %arg2[%c0_3, %c0_4] : memref<16x1xf32, #tpu.memory_space<vmem>>, vector<16x1xf32>
    %c0_5 = arith.constant 0 : index
    %c0_6 = arith.constant 0 : index
    %3 = vector.load %arg3[%c0_5, %c0_6] : memref<128x128xf32, #tpu.memory_space<vmem>>, vector<128x128xf32>
    %cst = arith.constant dense<0.000000e+00> : vector<16x128xf32>
    %4 = tpu.matmul %0, %3, %cst {dimension_numbers = #tpu.dot_dimension_numbers<[1], [0], [0], [1], [0, 0, 1, 1], [], []>} : vector<16x128xf32>, vector<128x128xf32>, vector<16x128xf32> -> vector<16x128xf32>
    %5 = vector.broadcast %2 : vector<16x1xf32> to vector<16x128xf32>
    %6 = arith.mulf %5, %4 : vector<16x128xf32>
    %7 = arith.truncf %6 : vector<16x128xf32> to vector<16x128xbf16>
    %cst_7 = arith.constant dense<0.000000e+00> : vector<16x128xf32>
    %8 = tpu.matmul %1, %7, %cst_7 {dimension_numbers = #tpu.dot_dimension_numbers<[1], [0], [0], [1], [0, 0, 1, 1], [], []>} : vector<16x16xbf16>, vector<16x128xbf16>, vector<16x128xf32> -> vector<16x128xf32>
    %9 = vector.broadcast %2 : vector<16x1xf32> to vector<16x128xf32>
    %10 = arith.mulf %9, %8 : vector<16x128xf32>
    %c0_8 = arith.constant 0 : index
    %c0_9 = arith.constant 0 : index
    %11 = vector.load %arg4[%c0_8, %c0_9] : memref<1x128xf32, #tpu.memory_space<vmem>>, vector<1x128xf32>
    %12 = vector.broadcast %11 : vector<1x128xf32> to vector<16x128xf32>
    %13 = arith.addf %10, %12 : vector<16x128xf32>
    %cst_10 = arith.constant 0.000000e+00 : f32
    %14 = vector.broadcast %cst_10 : f32 to vector<16x128xf32>
    %15 = arith.maximumf %13, %14 : vector<16x128xf32>
    %c0_11 = arith.constant 0 : index
    %c0_12 = arith.constant 0 : index
    %16 = vector.load %arg5[%c0_11, %c0_12] : memref<128x128xf32, #tpu.memory_space<vmem>>, vector<128x128xf32>
    %cst_13 = arith.constant dense<0.000000e+00> : vector<16x128xf32>
    %17 = tpu.matmul %15, %16, %cst_13 {dimension_numbers = #tpu.dot_dimension_numbers<[1], [0], [0], [1], [0, 0, 1, 1], [], []>} : vector<16x128xf32>, vector<128x128xf32>, vector<16x128xf32> -> vector<16x128xf32>
    %18 = vector.broadcast %2 : vector<16x1xf32> to vector<16x128xf32>
    %19 = arith.mulf %18, %17 : vector<16x128xf32>
    %20 = arith.truncf %19 : vector<16x128xf32> to vector<16x128xbf16>
    %cst_14 = arith.constant dense<0.000000e+00> : vector<16x128xf32>
    %21 = tpu.matmul %1, %20, %cst_14 {dimension_numbers = #tpu.dot_dimension_numbers<[1], [0], [0], [1], [0, 0, 1, 1], [], []>} : vector<16x16xbf16>, vector<16x128xbf16>, vector<16x128xf32> -> vector<16x128xf32>
    %22 = vector.broadcast %2 : vector<16x1xf32> to vector<16x128xf32>
    %23 = arith.mulf %22, %21 : vector<16x128xf32>
    %c0_15 = arith.constant 0 : index
    %c0_16 = arith.constant 0 : index
    %24 = vector.load %arg6[%c0_15, %c0_16] : memref<1x128xf32, #tpu.memory_space<vmem>>, vector<1x128xf32>
    %25 = vector.broadcast %24 : vector<1x128xf32> to vector<16x128xf32>
    %26 = arith.addf %23, %25 : vector<16x128xf32>
    %cst_17 = arith.constant 0.000000e+00 : f32
    %27 = vector.broadcast %cst_17 : f32 to vector<16x128xf32>
    %28 = arith.maximumf %26, %27 : vector<16x128xf32>
    %c0_18 = arith.constant 0 : index
    %c0_19 = arith.constant 0 : index
    %29 = vector.load %arg7[%c0_18, %c0_19] : memref<128x128xf32, #tpu.memory_space<vmem>>, vector<128x128xf32>
    %cst_20 = arith.constant dense<0.000000e+00> : vector<16x128xf32>
    %30 = tpu.matmul %28, %29, %cst_20 {dimension_numbers = #tpu.dot_dimension_numbers<[1], [0], [0], [1], [0, 0, 1, 1], [], []>} : vector<16x128xf32>, vector<128x128xf32>, vector<16x128xf32> -> vector<16x128xf32>
    %31 = vector.broadcast %2 : vector<16x1xf32> to vector<16x128xf32>
    %32 = arith.mulf %31, %30 : vector<16x128xf32>
    %33 = arith.truncf %32 : vector<16x128xf32> to vector<16x128xbf16>
    %cst_21 = arith.constant dense<0.000000e+00> : vector<16x128xf32>
    %34 = tpu.matmul %1, %33, %cst_21 {dimension_numbers = #tpu.dot_dimension_numbers<[1], [0], [0], [1], [0, 0, 1, 1], [], []>} : vector<16x16xbf16>, vector<16x128xbf16>, vector<16x128xf32> -> vector<16x128xf32>
    %35 = vector.broadcast %2 : vector<16x1xf32> to vector<16x128xf32>
    %36 = arith.mulf %35, %34 : vector<16x128xf32>
    %c0_22 = arith.constant 0 : index
    %c0_23 = arith.constant 0 : index
    %37 = vector.load %arg8[%c0_22, %c0_23] : memref<1x128xf32, #tpu.memory_space<vmem>>, vector<1x128xf32>
    %38 = vector.broadcast %37 : vector<1x128xf32> to vector<16x128xf32>
    %39 = arith.addf %36, %38 : vector<16x128xf32>
    %c0_24 = arith.constant 0 : index
    %c0_25 = arith.constant 0 : index
    %40 = vector.load %arg9[%c0_24, %c0_25] : memref<16x128xf32, #tpu.memory_space<vmem>>, vector<16x128xf32>
    tpu.vector_store %arg9[%c0_24, %c0_25], %39 {strides = array<i32>} : memref<16x128xf32, #tpu.memory_space<vmem>>, vector<16x128xf32>,
    %41 = tpu.iota {dimensions = array<i32: 1>} : vector<16x128xi32>
    %c4_i32 = arith.constant 4 : i32
    %42 = vector.broadcast %c4_i32 : i32 to vector<16x128xi32>
    %43 = arith.cmpi slt, %41, %42 : vector<16x128xi32>
    %cst_26 = arith.constant -1.000000e+30 : f32
    %44 = vector.broadcast %cst_26 : f32 to vector<16x128xf32>
    %45 = arith.select %43, %39, %44 : vector<16x128xi1>, vector<16x128xf32>
    %cst_27 = arith.constant dense<0xFF800000> : vector<16xf32>
    %46 = vector.multi_reduction <maximumf>, %45, %cst_27 [1] : vector<16x128xf32> to vector<16xf32>
    %47 = vector.shape_cast %46 : vector<16xf32> to vector<16x1xf32>
    %48 = vector.broadcast %47 : vector<16x1xf32> to vector<16x128xf32>
    %49 = arith.subf %45, %48 : vector<16x128xf32>
    %50 = math.exp %49 : vector<16x128xf32>
    %cst_28 = arith.constant 0.000000e+00 : f32
    %51 = vector.broadcast %cst_28 : f32 to vector<16x128xf32>
    %52 = arith.select %43, %50, %51 : vector<16x128xi1>, vector<16x128xf32>
    %cst_29 = arith.constant dense<0.000000e+00> : vector<16xf32>
    %53 = vector.multi_reduction <add>, %52, %cst_29 [1] : vector<16x128xf32> to vector<16xf32>
    %54 = vector.shape_cast %53 : vector<16xf32> to vector<16x1xf32>
    %55 = math.log %54 : vector<16x1xf32>
    %56 = arith.addf %47, %55 : vector<16x1xf32>
    %57 = vector.broadcast %56 : vector<16x1xf32> to vector<16x128xf32>
    %58 = arith.subf %39, %57 : vector<16x128xf32>
    %c0_30 = arith.constant 0 : index
    %c0_31 = arith.constant 0 : index
    %59 = vector.load %arg10[%c0_30, %c0_31] : memref<16x128xf32, #tpu.memory_space<vmem>>, vector<16x128xf32>
    tpu.vector_store %arg10[%c0_30, %c0_31], %58 {strides = array<i32>} : memref<16x128xf32, #tpu.memory_space<vmem>>, vector<16x128xf32>,
    return
  }
}

</mosaic_0001>

<bundles_post_ra>
// kernel: tpu_custom_call.1
= control target key start
LH: loop header
LB: loop body
LE: loop exit
PB: predicated region body
PF: predicated region fallthrough
CT: control target
= control target key end

     0   :  { %16 = vsyncpa [#allocation3], 0  ;;  %s1298_s0 = inlined_call_operand.vmem [shape: f32[16,128], index: 0, kind: input, shape index: {}]   ;;  %s1299_s1 = inlined_call_operand.hbm [shape: bf16[16,16], index: 1, kind: input, shape index: {}]   ;;  %s1300_s2 = inlined_call_operand.vmem [shape: f32[16,1], index: 2, kind: input, shape index: {}]   ;;  %s1301_s3 = inlined_call_operand.hbm [shape: f32[128,128], index: 3, kind: input, shape index: {}]   ;;  %s1302_s4 = inlined_call_operand.vmem [shape: f32[1,128], index: 4, kind: input, shape index: {}]   ;;  %s1303_s5 = inlined_call_operand.hbm [shape: f32[128,128], index: 5, kind: input, shape index: {}]   ;;  %s1304_s6 = inlined_call_operand.vmem [shape: f32[1,128], index: 6, kind: input, shape index: {}]   ;;  %s1305_s7 = inlined_call_operand.hbm [shape: f32[128,128], index: 7, kind: input, shape index: {}]   ;;  %s1306_s8 = inlined_call_operand.vmem [shape: f32[1,128], index: 8, kind: input, shape index: {}]   ;;  %s1307_s9 = inlined_call_operand.hbm [shape: f32[16,128], index: 9, kind: output, shape index: {0}]   ;;  %s1308_s10 = inlined_call_operand.hbm [shape: f32[16,128], index: 10, kind: output, shape index: {1}]  }
   0x1   :  { %17 = vsyncpa [#allocation6], 0 }
   0x2   :  { %18 = vsyncpa [#allocation9], 0 }
   0x3   :  { %19 = vsyncpa [#allocation4], 0 }
   0x4   :  { %20 = vsyncpa [#allocation12], 0  ;;  %s1078_s13 = smov [#allocation5]   ;;  %s936_s17 = scalar_lea.hbm %s1301_s3, 2048 }
   0x5   :  { %s42_s14 = sshll.u32 %s1078_s13, 4  ;;  %p937_p0 = scmp.ne.s32.totalorder %s1301_s3, %s936_s17  ;;  %s43_s14 = int_to_ptr.vmem [resolvable:$true] %s42_s14 }
   0x6   :  { %p940_p1 = scmp.lt.u32.totalorder %s936_s17, %s1301_s3 }
   0x8   :  { %p942_p2 = pnand %p940_p1, %p937_p0 }
   0xa   :  { %945 = shalt.err (!%p942_p2)
}
   0xb   :  { %s946_s22 = scalar_lea.vmem %s43_s14, 2048  ;;  %p951_p4 = scmp.lt.s32.totalorder %s43_s14, %s43_s14 }
   0xc   :  { %p947_p3 = scmp.ne.s32.totalorder %s43_s14, %s946_s22  ;;  %p952_p5 = scmp.lt.s32.totalorder %s946_s22, %s946_s22 }
   0xe   :  { %p953_p6 = por %p952_p5, %p951_p4 }
  0x10   :  { %p954_p7 = pnand %p953_p6, %p947_p3 }
  0x12   :  { %957 = shalt.err (!%p954_p7)
}
  0x13   :  { %s1079_s23 = smov 128   ;;  %s1080_s24 = smov 8  }
  0x14   :  { %48 = dma.hbm_to_vmem [thread:$0]  %s1301_s3, 2048, %s43_s14, [#allocation6], %s1079_s23, %s1079_s23, %s1080_s24  }
  0x15   :  { %s1081_s27 = smov [#allocation2]   ;;  %s958_s11 = scalar_lea.hbm %s1299_s1, 128 }
  0x16   :  { %s28_s28 = sshll.u32 %s1081_s27, 4  ;;  %p959_p8 = scmp.ne.s32.totalorder %s1299_s1, %s958_s11  ;;  %s29_s28 = int_to_ptr.vmem [resolvable:$true] %s28_s28 }
  0x17   :  { %p962_p9 = scmp.lt.u32.totalorder %s958_s11, %s1299_s1 }
  0x19   :  { %p964_p10 = pnand %p962_p9, %p959_p8 }
  0x1b   :  { %967 = shalt.err (!%p964_p10)
}
  0x1c   :  { %s968_s17 = scalar_lea.vmem %s29_s28, 128  ;;  %p973_p12 = scmp.lt.s32.totalorder %s29_s28, %s29_s28 }
  0x1d   :  { %p969_p11 = scmp.ne.s32.totalorder %s29_s28, %s968_s17  ;;  %p974_p13 = scmp.lt.s32.totalorder %s968_s17, %s968_s17 }
  0x1f   :  { %p975_p0 = por %p974_p13, %p973_p12 }
  0x21   :  { %p976_p1 = pnand %p975_p0, %p969_p11 }
  0x23   :  { %979 = shalt.err (!%p976_p1)
}
  0x24   :  { %s1082_s3 = smov 64   ;;  %s1083_s14 = smov 4  }
  0x25   :  { %34 = dma.hbm_to_vmem [thread:$0]  %s1299_s1, 128, %s29_s28, [#allocation3], %s1082_s3, %s1082_s3, %s1083_s14  }
  0x26   :  { %s1084_s20 = smov [#allocation7]   ;;  %s1085_s22 = smov [#allocation8]  }
  0x27   :  { %s56_s21 = sshll.u32 %s1084_s20, 4  ;;  %s70_s25 = sshll.u32 %s1085_s22, 4  ;;  %s57_s21 = int_to_ptr.vmem [resolvable:$true] %s56_s21  ;;  %s1173_s25 = int_to_ptr.vmem [resolvable:$true] %s70_s25 }
  0x28   :  { %s980_s29 = scalar_lea.hbm %s1303_s5, 2048 }
  0x29   :  { %p981_p2 = scmp.ne.s32.totalorder %s1303_s5, %s980_s29  ;;  %p984_p3 = scmp.lt.u32.totalorder %s980_s29, %s1303_s5 }
  0x2b   :  { %p986_p4 = pnand %p984_p3, %p981_p2 }
  0x2d   :  { %989 = shalt.err (!%p986_p4)
}
  0x2e   :  { %s990_s1 = scalar_lea.vmem %s57_s21, 2048  ;;  %p995_p6 = scmp.lt.s32.totalorder %s57_s21, %s57_s21 }
  0x2f   :  { %p991_p5 = scmp.ne.s32.totalorder %s57_s21, %s990_s1  ;;  %p996_p7 = scmp.lt.s32.totalorder %s990_s1, %s990_s1 }
  0x31   :  { %p997_p8 = por %p996_p7, %p995_p6 }
  0x33   :  { %p998_p9 = pnand %p997_p8, %p991_p5 }
  0x35   :  { %1001 = shalt.err (!%p998_p9)
}
  0x36   :  { %62 = dma.hbm_to_vmem [thread:$0]  %s1303_s5, 2048, %s57_s21, [#allocation6], %s1079_s23, %s1079_s23, %s1080_s24  }
  0x37   :  { %s1002_s3 = scalar_lea.hbm %s1305_s7, 2048 }
  0x38   :  { %p1003_p10 = scmp.ne.s32.totalorder %s1305_s7, %s1002_s3  ;;  %p1006_p11 = scmp.lt.u32.totalorder %s1002_s3, %s1305_s7 }
  0x3a   :  { %p1008_p12 = pnand %p1006_p11, %p1003_p10 }
  0x3c   :  { %1011 = shalt.err (!%p1008_p12)
}
  0x3d   :  { %s1012_s22 = scalar_lea.vmem %s1173_s25, 2048  ;;  %p1017_p0 = scmp.lt.s32.totalorder %s1173_s25, %s1173_s25 }
  0x3e   :  { %p1013_p13 = scmp.ne.s32.totalorder %s1173_s25, %s1012_s22  ;;  %p1018_p1 = scmp.lt.s32.totalorder %s1012_s22, %s1012_s22 }
  0x40   :  { %p1019_p2 = por %p1018_p1, %p1017_p0 }
  0x42   :  { %p1020_p3 = pnand %p1019_p2, %p1013_p13 }
  0x44   :  { %1023 = shalt.err (!%p1020_p3)
}
  0x45   :  { %76 = dma.hbm_to_vmem [thread:$0]  %s1305_s7, 2048, %s1173_s25, [#allocation9], %s1079_s23, %s1079_s23, %s1080_s24  }
  0x46   :  { %1068 = dma.done.wait [#allocation3], 128  }
  0x47   :  { %1069 = vsyncadd [#allocation3], 4294967168 }
  0x48   :  { %1070 = dma.done.wait [#allocation6], 4096  }
  0x49   :  { %1071 = vsyncadd [#allocation6], 4294963200 }
  0x4a   :  { %1072 = dma.done.wait [#allocation9], 2048  }
  0x4b   :  { %1073 = vsyncadd [#allocation9], 4294965248  ;;  %v1086_v0 = vmov 0   ;;  %v98_v1 = vld [vmem:[#allocation5] sm:$0xff]  ;;  %v99_v2 = vld [vmem:[#allocation5 + $0x8] sm:$0xff]  ;;  %v1087_v29 = vmov 0.0  }
  0x4c   :  { %926 = vset.pattern.permute.xlu0 %v1086_v0  ;;  %v100_v3 = vld [vmem:[#allocation5 + $0x10] sm:$0xff]  ;;  %v817_v4 = vpack.c.bf16 %v99_v2, %v98_v1  ;;  %v101_v5 = vld [vmem:[#allocation5 + $0x18] sm:$0xff]  ;;  %v102_v7 = vld [vmem:[#allocation5 + $0x20] sm:$0xff]  ;;  %729 = vmatprep.subr.bf16.mxu1 %v1087_v29  ;;  %vm1088_vm0 = vmmov 0   ;;  %vm207_vm1 = vcmask 130048  }
  0x4d   :  { %v821_v6 = vpack.c.bf16 %v101_v5, %v100_v3  ;;  %v103_v8 = vld [vmem:[#allocation5 + $0x28] sm:$0xff]  ;;  %v104_v10 = vld [vmem:[#allocation5 + $0x30] sm:$0xff]  ;;  %v92_v11 = vld [vmem:[%s1298_s0] sm:$0xff]  ;;  %731 = vmatprep.mubr.msk.bf16.mxu1 %vm1088_vm0, %v1087_v29 }
  0x4e   :  { %818 = vmatprep.subr.bf16.mxu0 %v817_v4  ;;  %v825_v9 = vpack.c.bf16 %v103_v8, %v102_v7  ;;  %v105_v12 = vld [vmem:[#allocation5 + $0x38] sm:$0xff]  ;;  %726 = vmatprep.mubr.f32.mxu0 %v92_v11  ;;  %v97_v14 = vld [vmem:[%s1300_s2 + $0x8] sm:$0xff]  ;;  %v107_v17 = vld [vmem:[#allocation5 + $0x48] sm:$0xff] }
  0x4f   :  { %820 = vmatpush3.bf16.msra.mxu0 %v817_v4  ;;  %v96_v13 = vld [vmem:[%s1300_s2] sm:$0xff]  ;;  %v829_v15 = vpack.c.bf16 %v105_v12, %v104_v10  ;;  %v106_v16 = vld [vmem:[#allocation5 + $0x40] sm:$0xff]  ;;  %v108_v19 = vld [vmem:[#allocation5 + $0x50] sm:$0xff] }
  0x50   :  { %822 = vmatprep.subr.bf16.mxu0 %v821_v6  ;;  %191 = vperm.xlu0 %926, %v96_v13   ;;  %v833_v18 = vpack.c.bf16 %v107_v17, %v106_v16  ;;  %v109_v20 = vld [vmem:[#allocation5 + $0x58] sm:$0xff]  ;;  %v110_v22 = vld [vmem:[#allocation5 + $0x60] sm:$0xff]  ;;  %v111_v23 = vld [vmem:[#allocation5 + $0x68] sm:$0xff] }
  0x51   :  { %v837_v21 = vpack.c.bf16 %v109_v20, %v108_v19  ;;  %v841_v24 = vpack.c.bf16 %v111_v23, %v110_v22  ;;  %v112_v25 = vld [vmem:[#allocation5 + $0x70] sm:$0xff]  ;;  %v113_v26 = vld [vmem:[#allocation5 + $0x78] sm:$0xff]  ;;  %v93_v28 = vld [vmem:[%s1298_s0 + $0x8] sm:$0xff] }
  0x52   :  { %v845_v27 = vpack.c.bf16 %v113_v26, %v112_v25  ;;  %v265_v33 = vld [vmem:[#allocation7] sm:$0xff]  ;;  %v266_v34 = vld [vmem:[#allocation7 + $0x8] sm:$0xff]  ;;  %v267_v40 = vld [vmem:[#allocation7 + $0x10] sm:$0xff] }
  0x53   :  { %824 = vmatpush3.bf16.msra.mxu0 %v821_v6  ;;  %v849_v38 = vpack.c.bf16 %v266_v34, %v265_v33  ;;  %v268_v41 = vld [vmem:[#allocation7 + $0x18] sm:$0xff]  ;;  %v269_v44 = vld [vmem:[#allocation7 + $0x20] sm:$0xff]  ;;  %v270_v45 = vld [vmem:[#allocation7 + $0x28] sm:$0xff] }
  0x54   :  { %826 = vmatprep.subr.bf16.mxu0 %v825_v9  ;;  %196 = vperm.xlu0 %926, %v97_v14   ;;  %v1231_v42 = vld [vmem:[#allocation2] sm:$0xff]   ;;  %v853_v43 = vpack.c.bf16 %v268_v41, %v267_v40  ;;  %v857_v46 = vpack.c.bf16 %v270_v45, %v269_v44  ;;  %v271_v47 = vld [vmem:[#allocation7 + $0x30] sm:$0xff]  ;;  %v273_v50 = vld [vmem:[#allocation7 + $0x40] sm:$0xff] }
  0x55   :  { %v272_v48 = vld [vmem:[#allocation7 + $0x38] sm:$0xff]  ;;  %v274_v51 = vld [vmem:[#allocation7 + $0x48] sm:$0xff]  ;;  %v275_v53 = vld [vmem:[#allocation7 + $0x50] sm:$0xff] }
  0x56   :  { %v861_v49 = vpack.c.bf16 %v272_v48, %v271_v47  ;;  %v865_v52 = vpack.c.bf16 %v274_v51, %v273_v50  ;;  %v276_v54 = vld [vmem:[#allocation7 + $0x58] sm:$0xff]  ;;  %v277_v56 = vld [vmem:[#allocation7 + $0x60] sm:$0xff]  ;;  %v278_v57 = vld [vmem:[#allocation7 + $0x68] sm:$0xff] }
  0x57   :  { %828 = vmatpush3.bf16.msra.mxu0 %v825_v9  ;;  %v869_v55 = vpack.c.bf16 %v276_v54, %v275_v53  ;;  %v873_v58 = vpack.c.bf16 %v278_v57, %v277_v56  ;;  %v279_v59 = vld [vmem:[#allocation7 + $0x70] sm:$0xff]  ;;  %v280_v60 = vld [vmem:[#allocation7 + $0x78] sm:$0xff]  ;;  %v413_v9 = vld [vmem:[#allocation8] sm:$0xff]  ;;  %v561_v57 = vlaneseq }
  0x58   :  { %830 = vmatprep.subr.bf16.mxu0 %v829_v15  ;;  %v877_v61 = vpack.c.bf16 %v280_v60, %v279_v59  ;;  %v629_v63 = vld [vmem:[%s1302_s4] ss:$0 sm:$0xff]  ;;  %v414_v10 = vld [vmem:[#allocation8 + $0x8] sm:$0xff]  ;;  %v415_v11 = vld [vmem:[#allocation8 + $0x10] sm:$0xff] }
  0x59   :  { %v881_v12 = vpack.c.bf16 %v414_v10, %v413_v9  ;;  %v416_v13 = vld [vmem:[#allocation8 + $0x18] sm:$0xff]  ;;  %v418_v16 = vld [vmem:[#allocation8 + $0x28] sm:$0xff] }
  0x5a   :  { %v885_v14 = vpack.c.bf16 %v416_v13, %v415_v11  ;;  %v420_v19 = vld [vmem:[#allocation8 + $0x38] sm:$0xff]  ;;  %v422_v22 = vld [vmem:[#allocation8 + $0x48] sm:$0xff] }
  0x5b   :  { %832 = vmatpush3.bf16.msra.mxu0 %v829_v15  ;;  %v417_v15 = vld [vmem:[#allocation8 + $0x20] sm:$0xff]  ;;  %v424_v25 = vld [vmem:[#allocation8 + $0x58] sm:$0xff] }
  0x5c   :  { %834 = vmatprep.subr.bf16.mxu0 %v833_v18  ;;  %v889_v17 = vpack.c.bf16 %v418_v16, %v417_v15  ;;  %v633_v60 = vld [vmem:[%s1306_s8] ss:$0 sm:$0xff]  ;;  %s1089_s8 = smov [#allocation10]  }
  0x5d   :  { %s597_s28 = sshll.u32 %s1089_s8, 4  ;;  %s598_s28 = int_to_ptr.vmem [resolvable:$true] %s597_s28 }
  0x5e   :  { %s1024_s15 = scalar_lea.vmem %s598_s28, 256  ;;  %p1029_p5 = scmp.lt.s32.totalorder %s598_s28, %s598_s28 }
  0x5f   :  { %836 = vmatpush3.bf16.msra.mxu0 %v833_v18  ;;  %v419_v18 = vld [vmem:[#allocation8 + $0x30] sm:$0xff]  ;;  %p1025_p4 = scmp.ne.s32.totalorder %s598_s28, %s1024_s15  ;;  %p1030_p6 = scmp.lt.s32.totalorder %s1024_s15, %s1024_s15 }
  0x60   :  { %838 = vmatprep.subr.bf16.mxu0 %v837_v21  ;;  %v893_v20 = vpack.c.bf16 %v420_v19, %v419_v18 }
  0x61   :  { %p1031_p7 = por %p1030_p6, %p1029_p5 }
  0x63   :  { %840 = vmatpush3.bf16.msra.mxu0 %v837_v21  ;;  %v421_v21 = vld [vmem:[#allocation8 + $0x40] sm:$0xff]  ;;  %p1032_p8 = pnand %p1031_p7, %p1025_p4 }
  0x64   :  { %842 = vmatprep.subr.bf16.mxu0 %v841_v24  ;;  %v897_v23 = vpack.c.bf16 %v422_v22, %v421_v21 }
  0x67   :  { %844 = vmatpush3.bf16.msra.mxu0 %v841_v24  ;;  %v423_v24 = vld [vmem:[#allocation8 + $0x50] sm:$0xff] }
  0x68   :  { %846 = vmatprep.subr.bf16.mxu0 %v845_v27  ;;  %v901_v26 = vpack.c.bf16 %v424_v25, %v423_v24 }
  0x6b   :  { %848 = vmatpush3.bf16.msra.mxu0 %v845_v27 }
  0x6c   :  { %882 = vmatprep.subr.bf16.mxu0 %v881_v12 }
  0x6e   :  { %727 = vmatmul.mubr.f32.vlgmr.msra.gmra.mrb[0].mxu0 %v93_v28 }
  0x6f   :  { %884 = vmatpush3.bf16.msra.mxu0 %v881_v12 }
  0x70   :  { %886 = vmatprep.subr.bf16.mxu0 %v885_v14 }
  0x73   :  { %888 = vmatpush3.bf16.msra.mxu0 %v885_v14 }
  0x74   :  { %890 = vmatprep.subr.bf16.mxu0 %v889_v17 }
  0x77   :  { %892 = vmatpush3.bf16.msra.mxu0 %v889_v17 }
  0x78   :  { %894 = vmatprep.subr.bf16.mxu0 %v893_v20 }
  0x7b   :  { %896 = vmatpush3.bf16.msra.mxu0 %v893_v20 }
  0x7c   :  { %898 = vmatprep.subr.bf16.mxu0 %v897_v23 }
  0x7f   :  { %900 = vmatpush3.bf16.msra.mxu0 %v897_v23 }
  0x80   :  { %902 = vmatprep.subr.bf16.mxu0 %v901_v26 }
  0x83   :  { %904 = vmatpush3.bf16.msra.mxu0 %v901_v26 }
  0xcf   :  { %v1225_v30 = vpop.permute.xlu0 %191 }
  0xd3   :  { %v1227_v31 = vpop.permute.xlu0 %196 }
 0x141   :  { %v728_v32 = vpop.f32.mrb[0].mxu0 }
 0x142   :  { %v200_v35 = vmul.f32 %v728_v32, %v1227_v31  ;;  %v180_v36 = vpop.f32.mrb[1].mxu0 }
 0x143   :  { %v199_v37 = vmul.f32 %v1225_v30, %v180_v36  ;;  %v426_v36 = vld [vmem:[#allocation8 + $0x68] sm:$0xff] }
 0x145   :  { %v201_v39 = vpack.c.bf16 %v200_v35, %v199_v37  ;;  %v425_v35 = vld [vmem:[#allocation8 + $0x60] sm:$0xff] }
 0x146   :  { %v905_v37 = vpack.c.bf16 %v426_v36, %v425_v35 }
 0x147   :  { %730 = vmatpush3.bf16.msra.mxu1 %v201_v39  ;;  %v428_v39 = vld [vmem:[#allocation8 + $0x78] sm:$0xff] }
 0x148   :  { %850 = vmatprep.subr.bf16.mxu1 %v849_v38  ;;  %906 = vmatprep.subr.bf16.mxu0 %v905_v37 }
 0x149   :  { %908 = vmatpush3.bf16.msra.mxu0 %v905_v37 }
 0x14a   :  { %732 = vmatmul.mubr.msk.bf16.vlgmr.msra.gmra.mrb[0].mxu1 %vm207_vm1, %v1231_v42 }
 0x14b   :  { %852 = vmatpush3.bf16.msra.mxu1 %v849_v38  ;;  %v427_v38 = vld [vmem:[#allocation8 + $0x70] sm:$0xff] }
 0x14c   :  { %854 = vmatprep.subr.bf16.mxu1 %v853_v43  ;;  %v909_v40 = vpack.c.bf16 %v428_v39, %v427_v38 }
 0x14e   :  { %910 = vmatprep.subr.bf16.mxu0 %v909_v40 }
 0x14f   :  { %856 = vmatpush3.bf16.msra.mxu1 %v853_v43  ;;  %912 = vmatpush3.bf16.msra.mxu0 %v909_v40  ;;  %v631_v43 = vld [vmem:[%s1304_s6] ss:$0 sm:$0xff] }
 0x150   :  { %858 = vmatprep.subr.bf16.mxu1 %v857_v46 }
 0x153   :  { %860 = vmatpush3.bf16.msra.mxu1 %v857_v46 }
 0x154   :  { %862 = vmatprep.subr.bf16.mxu1 %v861_v49 }
 0x157   :  { %864 = vmatpush3.bf16.msra.mxu1 %v861_v49 }
 0x158   :  { %866 = vmatprep.subr.bf16.mxu1 %v865_v52 }
 0x15b   :  { %868 = vmatpush3.bf16.msra.mxu1 %v865_v52 }
 0x15c   :  { %870 = vmatprep.subr.bf16.mxu1 %v869_v55 }
 0x15f   :  { %872 = vmatpush3.bf16.msra.mxu1 %v869_v55 }
 0x160   :  { %874 = vmatprep.subr.bf16.mxu1 %v873_v58 }
 0x163   :  { %876 = vmatpush3.bf16.msra.mxu1 %v873_v58  ;;  %v562_v58 = vand.u32 127, %v561_v57 }
 0x164   :  { %878 = vmatprep.subr.bf16.mxu1 %v877_v61 }
 0x165   :  { %vm563_vm2 = vcmp.lt.s32.totalorder %v562_v58, 4 }
 0x167   :  { %880 = vmatpush3.bf16.msra.mxu1 %v877_v61 }
 0x168   :  { %770 = vmatprep.subr.bf16.mxu1 %v1087_v29 }
 0x21d   :  { %v245_v62 = vpop.f32.mrb[0].mxu1 }
 0x21e   :  { %v252_v0 = vmul.f32 %v245_v62, %v1225_v30  ;;  %v733_v1 = vpop.f32.mrb[1].mxu1 }
 0x21f   :  { %v248_v2 = vpop.f32.mrb[2].mxu1 }
 0x220   :  { %v261_v3 = vadd.f32 %v629_v63, %v252_v0  ;;  %v253_v4 = vmul.f32 %v248_v2, %v1227_v31  ;;  %v734_v5 = vpop.f32.mrb[3].mxu1 }
 0x222   :  { %v263_v6 = vmax.f32 %v261_v3, 0.0  ;;  %v262_v7 = vadd.f32 %v629_v63, %v253_v4 }
 0x224   :  { %v264_v8 = vmax.f32 %v262_v7, 0.0  ;;  %767 = vmatprep.mubr.f32.mxu1 %v263_v6 }
 0x226   :  { %768 = vmatmul.mubr.f32.vlgmr.msra.gmra.mrb[4].mxu1 %v264_v8 }
 0x227   :  { %772 = vmatprep.mubr.msk.bf16.mxu1 %vm1088_vm0, %v1087_v29 }
 0x2f9   :  { %v769_v27 = vpop.f32.mrb[4].mxu1 }
 0x2fa   :  { %v357_v28 = vmul.f32 %v769_v27, %v1227_v31  ;;  %v347_v32 = vpop.f32.mrb[5].mxu1 }
 0x2fb   :  { %v356_v33 = vmul.f32 %v347_v32, %v1225_v30 }
 0x2fd   :  { %v358_v34 = vpack.c.bf16 %v357_v28, %v356_v33 }
 0x2ff   :  { %771 = vmatpush3.bf16.msra.mxu1 %v358_v34 }
 0x300   :  { %811 = vmatprep.subr.bf16.mxu1 %v1087_v29 }
 0x302   :  { %773 = vmatmul.mubr.msk.bf16.vlgmr.msra.gmra.mrb[8].mxu1 %vm207_vm1, %v1231_v42 }
 0x303   :  { %813 = vmatprep.mubr.msk.bf16.mxu1 %vm1088_vm0, %v1087_v29 }
 0x3d5   :  { %v393_v41 = vpop.f32.mrb[8].mxu1 }
 0x3d6   :  { %v400_v44 = vmul.f32 %v393_v41, %v1225_v30  ;;  %v774_v45 = vpop.f32.mrb[9].mxu1 }
 0x3d7   :  { %v396_v46 = vpop.f32.mrb[10].mxu1 }
 0x3d8   :  { %v409_v29 = vadd.f32 %v631_v43, %v400_v44  ;;  %v401_v47 = vmul.f32 %v396_v46, %v1227_v31  ;;  %v775_v48 = vpop.f32.mrb[11].mxu1 }
 0x3da   :  { %v411_v49 = vmax.f32 %v409_v29, 0.0  ;;  %v410_v50 = vadd.f32 %v631_v43, %v401_v47 }
 0x3dc   :  { %v412_v51 = vmax.f32 %v410_v50, 0.0  ;;  %808 = vmatprep.mubr.f32.mxu0 %v411_v49 }
 0x3de   :  { %809 = vmatmul.mubr.f32.vlgmr.msra.gmra.mrb[2].mxu0 %v412_v51 }
 0x4b1   :  { %v810_v52 = vpop.f32.mrb[2].mxu0 }
 0x4b2   :  { %v505_v53 = vmul.f32 %v810_v52, %v1227_v31  ;;  %v495_v54 = vpop.f32.mrb[3].mxu0 }
 0x4b3   :  { %v504_v55 = vmul.f32 %v495_v54, %v1225_v30 }
 0x4b5   :  { %v506_v56 = vpack.c.bf16 %v505_v53, %v504_v55 }
 0x4b7   :  { %812 = vmatpush3.bf16.msra.mxu1 %v506_v56 }
 0x4ba   :  { %814 = vmatmul.mubr.msk.bf16.vlgmr.msra.gmra.mrb[12].mxu1 %vm207_vm1, %v1231_v42 }
 0x58d   :  { %v541_v59 = vpop.f32.mrb[12].mxu1 }
 0x58e   :  { %v548_v61 = vmul.f32 %v541_v59, %v1225_v30  ;;  %v815_v62 = vpop.f32.mrb[13].mxu1 }
 0x58f   :  { %v544_v63 = vpop.f32.mrb[14].mxu1 }
 0x590   :  { %v557_v0 = vadd.f32 %v633_v60, %v548_v61  ;;  %v549_v1 = vmul.f32 %v544_v63, %v1227_v31  ;;  %v816_v2 = vpop.f32.mrb[15].mxu1 }
 0x592   :  { %559 = vst [vmem:[#allocation10] sm:$0xff] %v557_v0  ;;  %v558_v3 = vadd.f32 %v633_v60, %v549_v1  ;;  %v564_v42 = vsel %vm563_vm2, %v557_v0, -1e+30 }
 0x593   :  { %566 = vmax.xlane.f32.xlu1 %v564_v42 }
 0x594   :  { %560 = vst [vmem:[#allocation10 + $0x8] sm:$0xff] %v558_v3  ;;  %v565_v4 = vsel %vm563_vm2, %v558_v3, -1e+30 }
 0x597   :  { %568 = vmax.xlane.f32.xlu1 %v565_v4 }
 0x620   :  { %v567_v5 = vpop.xlane.xlu1 %566 }
 0x621   :  { %v570_v6 = vsub.f32 %v564_v42, %v567_v5 }
 0x623   :  { %v572_v7 = vmul.f32 1.442695, %v570_v6 }
 0x624   :  { %v569_v30 = vpop.xlane.xlu1 %568 }
 0x625   :  { %928 = vpow2.f32 %v572_v7  ;;  %v571_v8 = vsub.f32 %v565_v4, %v569_v30 }
 0x627   :  { %v574_v9 = vmul.f32 1.442695, %v571_v8 }
 0x629   :  { %930 = vpow2.f32 %v574_v9 }
 0x62f   :  { %v929_v10 = vpop.eup %928 }
 0x630   :  { %v576_v31 = vsel %vm563_vm2, %v929_v10, 0.0 }
 0x631   :  { %578 = vadd.xlane.f32.xlu0 %v576_v31 }
 0x633   :  { %v931_v11 = vpop.eup %930 }
 0x634   :  { %v577_v12 = vsel %vm563_vm2, %v931_v11, 0.0 }
 0x635   :  { %580 = vadd.xlane.f32.xlu1 %v577_v12 }
 0x636   :  { %1035 = shalt.err (!%p1032_p8)
}
 0x637   :  { %s1036_s3 = scalar_lea.hbm %s1307_s9, 256 }
 0x638   :  { %p1037_p9 = scmp.ne.s32.totalorder %s1307_s9, %s1036_s3  ;;  %p1040_p10 = scmp.lt.u32.totalorder %s1036_s3, %s1307_s9 }
 0x63a   :  { %p1042_p11 = pnand %p1040_p10, %p1037_p9 }
 0x63c   :  { %1045 = shalt.err (!%p1042_p11)
}
 0x63d   :  { %603 = dma.vmem_to_hbm [thread:$0]  %s598_s28, 256, %s1307_s9, [#allocation4], %s1079_s23, %s1079_s23, %s1080_s24  }
 0x63e   :  { %s1090_s21 = smov [#allocation11]  }
 0x63f   :  { %s609_s7 = sshll.u32 %s1090_s21, 4  ;;  %s610_s7 = int_to_ptr.vmem [resolvable:$true] %s609_s7 }
 0x640   :  { %s1046_s25 = scalar_lea.vmem %s610_s7, 256  ;;  %p1051_p13 = scmp.lt.s32.totalorder %s610_s7, %s610_s7 }
 0x641   :  { %p1047_p12 = scmp.ne.s32.totalorder %s610_s7, %s1046_s25  ;;  %p1052_p0 = scmp.lt.s32.totalorder %s1046_s25, %s1046_s25 }
 0x643   :  { %p1053_p1 = por %p1052_p0, %p1051_p13 }
 0x645   :  { %p1054_p2 = pnand %p1053_p1, %p1047_p12 }
 0x6be   :  { %v579_v13 = vpop.xlane.xlu0 %578 }
 0x6bf   :  { %932 = vlog2.f32 %v579_v13 }
 0x6c2   :  { %v581_v14 = vpop.xlane.xlu1 %580 }
 0x6c3   :  { %934 = vlog2.f32 %v581_v14 }
 0x6c9   :  { %v933_v15 = vpop.eup %932 }
 0x6ca   :  { %v583_v16 = vmul.f32 0.6931472, %v933_v15 }
 0x6cc   :  { %v586_v17 = vadd.f32 %v583_v16, %v567_v5 }
 0x6cd   :  { %v935_v18 = vpop.eup %934 }
 0x6ce   :  { %v585_v19 = vmul.f32 0.6931472, %v935_v18  ;;  %v588_v20 = vsub.f32 %v557_v0, %v586_v17 }
 0x6d0   :  { %v587_v21 = vadd.f32 %v585_v19, %v569_v30  ;;  %590 = vst [vmem:[#allocation11] sm:$0xff] %v588_v20 }
 0x6d2   :  { %v589_v22 = vsub.f32 %v558_v3, %v587_v21 }
 0x6d4   :  { %591 = vst [vmem:[#allocation11 + $0x8] sm:$0xff] %v589_v22 }
 0x6d5   :  { %1057 = shalt.err (!%p1054_p2)
}
 0x6d6   :  { %s1058_s27 = scalar_lea.hbm %s1308_s10, 256 }
 0x6d7   :  { %p1059_p3 = scmp.ne.s32.totalorder %s1308_s10, %s1058_s27  ;;  %p1062_p4 = scmp.lt.u32.totalorder %s1058_s27, %s1308_s10 }
 0x6d9   :  { %p1064_p5 = pnand %p1062_p4, %p1059_p3 }
 0x6db   :  { %1067 = shalt.err (!%p1064_p5)
}
 0x6dc   :  { %615 = dma.vmem_to_hbm [thread:$0]  %s610_s7, 256, %s1308_s10, [#allocation12], %s1079_s23, %s1079_s23, %s1080_s24  }
 0x6dd   :  { %1074 = dma.done.wait [#allocation4], 256  }
 0x6de   :  { %1075 = vsyncadd [#allocation4], 4294967040 }
 0x6df   :  { %1076 = dma.done.wait [#allocation12], 256  }
 0x6e0   :  { %1077 = vsyncadd [#allocation12], 4294967040 }
 0x6e1   :  { %622 = vsyncpa [#allocation3], 1 }
 0x6e2   :  { %623 = vsyncpa [#allocation6], 1 }
 0x6e3   :  { %624 = vsyncpa [#allocation9], 1 }
 0x6e4   :  { %625 = vsyncpa [#allocation4], 1 }
 0x6e5   :  { %626 = vsyncpa [#allocation12], 1 }

</bundles_post_ra>
